<compile_context>
chip_gen: v6e
topology: v6e:2x2x1
jax: 0.10.0
libtpu: 0.0.40
codegen_flags: <defaults>
</compile_context>

<pallas_src>
import numpy as np
import jax
import jax.numpy as jnp
from jax import lax
from jax.experimental import pallas as pl
from jax.experimental.pallas import tpu as pltpu

LANE = 128


def _ceil_to(n, m):
    return ((n + m - 1) // m) * m


# ---------------------------------------------------------------------------
# Pallas kernels
# ---------------------------------------------------------------------------

def _encoder_kernel(x_ref, w_ref, b_ref, o_ref):
    # h = relu(x @ W_t + b); out = h * rsqrt(max(sum(h*h), 1e-24))
    # (== F.normalize(F.relu(...)); padded lanes stay exactly 0 so the norm is unaffected)
    h = jnp.dot(x_ref[...], w_ref[...], preferred_element_type=jnp.float32) + b_ref[...]
    h = jnp.maximum(h, 0.0)
    inv = lax.rsqrt(jnp.maximum(jnp.sum(h * h, axis=-1, keepdims=True), 1e-24))
    o_ref[...] = h * inv


def _inter_clf_kernel(x_ref, wi_ref, bi_ref, wc_ref, bc_ref, o_ref):
    # Fused: h2 = normalize(relu(x @ Wi + bi)); logits = h2 @ Wc + bc
    h = jnp.dot(x_ref[...], wi_ref[...], preferred_element_type=jnp.float32) + bi_ref[...]
    h = jnp.maximum(h, 0.0)
    inv = lax.rsqrt(jnp.maximum(jnp.sum(h * h, axis=-1, keepdims=True), 1e-24))
    h = h * inv
    o_ref[...] = jnp.dot(h, wc_ref[...], preferred_element_type=jnp.float32) + bc_ref[...]


def _sqdist_kernel(x_ref, o_ref):
    # Squared Euclidean distances via the Gram matrix (MXU), no [T,T,H] broadcast,
    # no sqrt (monotone, irrelevant for nearest-neighbor selection).
    x = x_ref[...]                                              # [T, H]
    sq = jnp.sum(x * x, axis=-1, keepdims=True)                 # [T, 1]
    gram = lax.dot_general(x, x, (((1,), (1,)), ((), ())),
                           preferred_element_type=jnp.float32)  # x @ x.T on the MXU
    o_ref[...] = sq + sq.T - 2.0 * gram


# ---------------------------------------------------------------------------
# Wrappers
# ---------------------------------------------------------------------------

def _row_grid(M, max_tile=512):
    # Small row counts: single full-array block. Large row counts: tile rows onto
    # a "parallel" grid axis (shards across both v7x TensorCores; harmless on v5e/v6e).
    if M <= max_tile:
        return M, 1
    return max_tile, pl.cdiv(M, max_tile)


def encoder_forward(x, w_t, b):
    M, K = x.shape
    N = w_t.shape[1]
    tm, gm = _row_grid(M)
    return pl.pallas_call(
        _encoder_kernel,
        out_shape=jax.ShapeDtypeStruct((M, N), jnp.float32),
        grid=(gm,),
        in_specs=[
            pl.BlockSpec((tm, K), lambda i: (i, 0)),
            pl.BlockSpec((K, N), lambda i: (0, 0)),
            pl.BlockSpec((1, N), lambda i: (0, 0)),
        ],
        out_specs=pl.BlockSpec((tm, N), lambda i: (i, 0)),
        compiler_params=pltpu.CompilerParams(dimension_semantics=("parallel",)),
    )(x, w_t, b)


def inter_clf_forward(x, wi_t, bi, wc_t, bc):
    M, H = x.shape
    C = wc_t.shape[1]
    tm, gm = _row_grid(M)
    return pl.pallas_call(
        _inter_clf_kernel,
        out_shape=jax.ShapeDtypeStruct((M, C), jnp.float32),
        grid=(gm,),
        in_specs=[
            pl.BlockSpec((tm, H), lambda i: (i, 0)),
            pl.BlockSpec((H, H), lambda i: (0, 0)),
            pl.BlockSpec((1, H), lambda i: (0, 0)),
            pl.BlockSpec((H, C), lambda i: (0, 0)),
            pl.BlockSpec((1, C), lambda i: (0, 0)),
        ],
        out_specs=pl.BlockSpec((tm, C), lambda i: (i, 0)),
        compiler_params=pltpu.CompilerParams(dimension_semantics=("parallel",)),
    )(x, wi_t, bi, wc_t, bc)


def pairwise_sqdist(x):
    # x: [T_pad, H_pad]; returns squared distances [T_pad, T_pad].
    T, H = x.shape
    return pl.pallas_call(
        _sqdist_kernel,
        out_shape=jax.ShapeDtypeStruct((T, T), jnp.float32),
        grid=(1,),
        in_specs=[pl.BlockSpec((T, H), lambda i: (0, 0))],
        out_specs=pl.BlockSpec((T, T), lambda i: (0, 0)),
        compiler_params=pltpu.CompilerParams(dimension_semantics=("arbitrary",)),
    )(x)


# ---------------------------------------------------------------------------
# SMOTE.fit_generate (host-side bookkeeping; Pallas kernel for distances,
# interpolation + gathers left to XLA so they fuse)
# ---------------------------------------------------------------------------

def smote_fit_generate(h, y_host, k, rng_key):
    # TODO(synk): the reference uses Python `random`; replaced with deterministic jax.random.
    y_host = np.asarray(y_host)
    num_classes = int(y_host.max()) + 1
    occ = np.bincount(y_host, minlength=num_classes)
    dominant = int(np.argmax(occ))
    n_occ = int(occ[dominant])

    xs_parts = [h]
    ys_parts = [jnp.asarray(y_host, dtype=jnp.int32)]

    for c in range(num_classes):
        if c == dominant or occ[c] < k:
            continue
        N = (n_occ - occ[c]) * 100.0 / occ[c]
        if N == 0:
            continue
        n_per = int(N / 100)            # synthetic samples per minority row
        if n_per == 0:
            continue                    # reference would concatenate an empty array

        idx = np.nonzero(y_host == c)[0]
        T = int(idx.shape[0])
        cand = h[jnp.asarray(idx)]                          # [T, H_pad] minority samples

        # Bucket T up to a multiple of 8 (sublane alignment + fewer distinct compiles).
        T_pad = int(max(8, _ceil_to(T, 8)))
        cand_p = jnp.pad(cand, ((0, T_pad - T), (0, 0)))

        d2 = pairwise_sqdist(cand_p)[:T]                    # Pallas kernel, [T, T_pad]
        col_ids = jnp.arange(T_pad)[None, :]
        row_ids = jnp.arange(T)[:, None]
        d2 = jnp.where(col_ids >= T, jnp.inf, d2)           # never pick padded rows
        d2 = jnp.where(col_ids == row_ids, -1.0, d2)        # self always sorts first

        # k nearest by squared distance (top-k instead of a full argsort), drop self.
        _, nbrs_full = lax.top_k(-d2, k)
        nbrs = nbrs_full[:, 1:k]                            # [T, k-1]

        rng_key, k_nn, k_gap = jax.random.split(rng_key, 3)
        nn_choice = jax.random.randint(k_nn, (T * n_per,), 0, k - 1)   # randint(0, k-2)
        gaps = jax.random.uniform(k_gap, (T * n_per, 1), dtype=jnp.float32)

        base_idx = jnp.repeat(jnp.arange(T), n_per)         # populate() iteration order
        neigh_idx = nbrs[base_idx, nn_choice]
        base_rows = cand[base_idx]
        neigh_rows = cand[neigh_idx]

        # single FMA over [S, H]: plain JAX so XLA fuses it with the gathers above
        syn = base_rows + gaps * (neigh_rows - base_rows)
        xs_parts.append(syn)
        ys_parts.append(jnp.full((T * n_per,), c, dtype=jnp.int32))

    return jnp.concatenate(xs_parts, axis=0), jnp.concatenate(ys_parts, axis=0)


# ---------------------------------------------------------------------------
# MLPSMOTE parameters / forward
# ---------------------------------------------------------------------------

def init_params(key, in_feats, n_hidden, n_classes):
    # Weights pre-transposed to [in, out] and zero-padded to 128 output lanes so
    # kernel stores are lane-dense; padded lanes carry exact zeros through relu
    # and therefore do not perturb the L2 normalization.
    gain = float(np.sqrt(2.0))          # nn.init.calculate_gain('relu')
    h_pad = _ceil_to(n_hidden, LANE)
    c_pad = _ceil_to(n_classes, LANE)
    ks = jax.random.split(key, 6)

    def xavier(k, fan_in, fan_out, in_pad, out_pad):
        limit = gain * np.sqrt(6.0 / (fan_in + fan_out))
        w = jax.random.uniform(k, (fan_in, fan_out), jnp.float32, -limit, limit)
        return jnp.pad(w, ((0, in_pad - fan_in), (0, out_pad - fan_out)))

    def bias(k, fan_in, fan_out, out_pad):
        bound = 1.0 / np.sqrt(fan_in)   # nn.Linear default bias init
        b = jax.random.uniform(k, (1, fan_out), jnp.float32, -bound, bound)
        return jnp.pad(b, ((0, 0), (0, out_pad - fan_out)))

    return {
        "enc_w_t": xavier(ks[0], in_feats, n_hidden, in_feats, h_pad),
        "enc_b": bias(ks[1], in_feats, n_hidden, h_pad),
        "inter_w_t": xavier(ks[2], n_hidden, n_hidden, h_pad, h_pad),
        "inter_b": bias(ks[3], n_hidden, n_hidden, h_pad),
        "clf_w_t": xavier(ks[4], n_hidden, n_classes, h_pad, c_pad),
        "clf_b": bias(ks[5], n_hidden, n_classes, c_pad),
    }


def mlpsmote_forward(params, input_feats, batch_labels_host, rng_key, n_classes):
    # encoder -> relu -> L2 normalize   (fused Pallas kernel, lane-padded hidden)
    h = encoder_forward(input_feats, params["enc_w_t"], params["enc_b"])
    # TODO(synk): nn.Dropout(0.5) treated as inference-mode identity (no RNG mask applied).

    # SMOTE oversampling on the hidden representation
    h_aug, y_aug = smote_fit_generate(h, batch_labels_host, k=3, rng_key=rng_key)

    # interlinear -> relu -> L2 normalize -> classifier   (single fused Pallas kernel)
    logits_pad = inter_clf_forward(h_aug, params["inter_w_t"], params["inter_b"],
                                   params["clf_w_t"], params["clf_b"])
    # strip the lane padding of the class dim; y.long() -> int32 (jax x64 disabled)
    return logits_pad[:, :n_classes], y_aug.astype(jnp.int32)


if __name__ == "__main__":
    B, in_feats, n_hidden, n_classes = 24, 32, 32, 4

    root = jax.random.PRNGKey(0)
    k_param, k_x, k_smote = jax.random.split(root, 3)

    params = init_params(k_param, in_feats, n_hidden, n_classes)
    x = jax.random.normal(k_x, (B, in_feats), dtype=jnp.float32)
    # imbalanced labels: 18 x class 0 (dominant), 6 x class 1 (minority, gets SMOTE'd)
    y = np.array([0] * 18 + [1] * 6, dtype=np.int32)

    logits, y_aug = mlpsmote_forward(params, x, y, k_smote, n_classes)
    jax.block_until_ready((logits, y_aug))

    # sanity: 6 minority rows, N = (18-6)*100/6 = 200 -> 2 synthetics each -> 12 extra rows
    assert logits.shape == (B + 12, n_classes), logits.shape
    assert y_aug.shape == (B + 12,), y_aug.shape
    assert bool(jnp.all(jnp.isfinite(logits)))

    print("KERNEL_OK")
</pallas_src>

<mosaic_0001>
module attributes {stable_mosaic.version = 11 : i64} {
  func.func @_encoder_kernel(%arg0: i32, %arg1: memref<24x32xf32, #tpu.memory_space<vmem>>, %arg2: memref<32x128xf32, #tpu.memory_space<vmem>>, %arg3: memref<1x128xf32, #tpu.memory_space<vmem>>, %arg4: memref<24x128xf32, #tpu.memory_space<vmem>>) attributes {dimension_semantics = [#tpu.dimension_semantics<parallel>], iteration_bounds = array<i64: 1>, scalar_prefetch = 0 : i64, scratch_operands = 0 : i64, tpu.core_type = #tpu.core_type<tc>, window_params = [{transform_indices = @transform_0, window_bounds = array<i64: 24, 32>}, {pipeline_mode = #tpu.pipeline_mode<synchronous>, transform_indices = @transform_1, window_bounds = array<i64: 32, 128>}, {pipeline_mode = #tpu.pipeline_mode<synchronous>, transform_indices = @transform_2, window_bounds = array<i64: 1, 128>}, {transform_indices = @transform_3, window_bounds = array<i64: 24, 128>}]} {
    %c0 = arith.constant 0 : index
    %c0_0 = arith.constant 0 : index
    %0 = vector.load %arg1[%c0, %c0_0] : memref<24x32xf32, #tpu.memory_space<vmem>>, vector<24x32xf32>
    %c0_1 = arith.constant 0 : index
    %c0_2 = arith.constant 0 : index
    %1 = vector.load %arg2[%c0_1, %c0_2] : memref<32x128xf32, #tpu.memory_space<vmem>>, vector<32x128xf32>
    %cst = arith.constant dense<0.000000e+00> : vector<24x128xf32>
    %2 = tpu.matmul %0, %1, %cst {dimension_numbers = #tpu.dot_dimension_numbers<[1], [0], [0], [1], [0, 0, 1, 1], [], []>} : vector<24x32xf32>, vector<32x128xf32>, vector<24x128xf32> -> vector<24x128xf32>
    %c0_3 = arith.constant 0 : index
    %c0_4 = arith.constant 0 : index
    %3 = vector.load %arg3[%c0_3, %c0_4] : memref<1x128xf32, #tpu.memory_space<vmem>>, vector<1x128xf32>
    %4 = vector.broadcast %3 : vector<1x128xf32> to vector<24x128xf32>
    %5 = arith.addf %2, %4 : vector<24x128xf32>
    %cst_5 = arith.constant 0.000000e+00 : f32
    %6 = vector.broadcast %cst_5 : f32 to vector<24x128xf32>
    %7 = arith.maximumf %5, %6 : vector<24x128xf32>
    %8 = arith.mulf %7, %7 : vector<24x128xf32>
    %cst_6 = arith.constant dense<0.000000e+00> : vector<24xf32>
    %9 = vector.multi_reduction <add>, %8, %cst_6 [1] : vector<24x128xf32> to vector<24xf32>
    %10 = vector.shape_cast %9 : vector<24xf32> to vector<24x1xf32>
    %cst_7 = arith.constant 1.000000e-24 : f32
    %11 = vector.broadcast %cst_7 : f32 to vector<24x1xf32>
    %12 = arith.maximumf %10, %11 : vector<24x1xf32>
    %13 = math.rsqrt %12 : vector<24x1xf32>
    %14 = vector.broadcast %13 : vector<24x1xf32> to vector<24x128xf32>
    %15 = arith.mulf %7, %14 : vector<24x128xf32>
    %c0_8 = arith.constant 0 : index
    %c0_9 = arith.constant 0 : index
    %16 = vector.load %arg4[%c0_8, %c0_9] : memref<24x128xf32, #tpu.memory_space<vmem>>, vector<24x128xf32>
    tpu.vector_store %arg4[%c0_8, %c0_9], %15 {strides = array<i32>} : memref<24x128xf32, #tpu.memory_space<vmem>>, vector<24x128xf32>,
    return
  }
  func.func @transform_0(%arg0: i32) -> (i32, i32) {
    %c0_i32 = arith.constant 0 : i32
    %c0_i32_0 = arith.constant 0 : i32
    return %arg0, %c0_i32 : i32, i32
  }
  func.func @transform_1(%arg0: i32) -> (i32, i32) {
    %c0_i32 = arith.constant 0 : i32
    %c0_i32_0 = arith.constant 0 : i32
    %c0_i32_1 = arith.constant 0 : i32
    return %c0_i32, %c0_i32_0 : i32, i32
  }
  func.func @transform_2(%arg0: i32) -> (i32, i32) {
    %c0_i32 = arith.constant 0 : i32
    %c0_i32_0 = arith.constant 0 : i32
    %c0_i32_1 = arith.constant 0 : i32
    return %c0_i32, %c0_i32_0 : i32, i32
  }
  func.func @transform_3(%arg0: i32) -> (i32, i32) {
    %c0_i32 = arith.constant 0 : i32
    %c0_i32_0 = arith.constant 0 : i32
    return %arg0, %c0_i32 : i32, i32
  }
}

</mosaic_0001>

<bundles_post_ra>
// kernel: tpu_custom_call.1
= control target key start
LH: loop header
LB: loop body
LE: loop exit
PB: predicated region body
PF: predicated region fallthrough
CT: control target
= control target key end

     0   :  { %8 = vsyncpa [#allocation3], 0  ;;  %s355_s0 = inlined_call_operand.hbm [shape: f32[24,32], index: 0, kind: input, shape index: {}]   ;;  %s356_s1 = inlined_call_operand.hbm [shape: f32[32,128], index: 1, kind: input, shape index: {}]   ;;  %s357_s2 = inlined_call_operand.vmem [shape: f32[1,128], index: 2, kind: input, shape index: {}]   ;;  %s358_s3 = inlined_call_operand.hbm [shape: f32[24,128], index: 3, kind: output, shape index: {}]  }
   0x1   :  { %9 = vsyncpa [#allocation6], 0 }
   0x2   :  { %10 = vsyncpa [#allocation4], 0  ;;  %s304_s12 = smov [#allocation2]  }
   0x3   :  { %s16_s13 = sshll.u32 %s304_s12, 4  ;;  %s17_s13 = int_to_ptr.vmem [resolvable:$true] %s16_s13 }
   0x4   :  { %s246_s14 = scalar_lea.vmem %s17_s13, 384  ;;  %p251_p1 = scmp.lt.s32.totalorder %s17_s13, %s17_s13 }
   0x5   :  { %p247_p0 = scmp.ne.s32.totalorder %s17_s13, %s246_s14  ;;  %p252_p2 = scmp.lt.s32.totalorder %s246_s14, %s246_s14 }
   0x7   :  { %p253_p3 = por %p252_p2, %p251_p1 }
   0x9   :  { %p254_p4 = pnand %p253_p3, %p247_p0 }
   0xb   :  { %257 = shalt.err (!%p254_p4)
}
   0xc   :  { %s305_s15 = smov 128   ;;  %s306_s16 = smov 8  }
   0xd   :  { %22 = dma.hbm_to_vmem [thread:$0]  %s355_s0, 384, %s17_s13, [#allocation3], %s305_s15, %s305_s15, %s306_s16  }
   0xe   :  { %s307_s19 = smov [#allocation5]  }
   0xf   :  { %s28_s20 = sshll.u32 %s307_s19, 4  ;;  %s29_s20 = int_to_ptr.vmem [resolvable:$true] %s28_s20 }
  0x10   :  { %s266_s21 = scalar_lea.vmem %s29_s20, 512  ;;  %p271_p6 = scmp.lt.s32.totalorder %s29_s20, %s29_s20 }
  0x11   :  { %p267_p5 = scmp.ne.s32.totalorder %s29_s20, %s266_s21  ;;  %p272_p7 = scmp.lt.s32.totalorder %s266_s21, %s266_s21 }
  0x13   :  { %p273_p8 = por %p272_p7, %p271_p6 }
  0x15   :  { %p274_p9 = pnand %p273_p8, %p267_p5 }
  0x17   :  { %277 = shalt.err (!%p274_p9)
}
  0x18   :  { %34 = dma.hbm_to_vmem [thread:$0]  %s356_s1, 512, %s29_s20, [#allocation6], %s305_s15, %s305_s15, %s306_s16  }
  0x19   :  { %298 = dma.done.wait [#allocation3], 384  }
  0x1a   :  { %299 = vsyncadd [#allocation3], 4294966912 }
  0x1b   :  { %300 = dma.done.wait [#allocation6], 512  }
  0x1c   :  { %301 = vsyncadd [#allocation6], 4294966784  ;;  %v308_v0 = vmov 0.0   ;;  %vm309_vm0 = vmmov 0   ;;  %v49_v1 = vld [vmem:[#allocation5 + $0x18] sm:$0xff]  ;;  %v48_v2 = vld [vmem:[#allocation5 + $0x10] sm:$0xff] }
  0x1d   :  { %200 = vmatprep.subr.mxu0 %v308_v0  ;;  %217 = vmatprep.subr.mxu1 %v308_v0  ;;  %v47_v3 = vld [vmem:[#allocation5 + $0x8] sm:$0xff]  ;;  %v46_v4 = vld [vmem:[#allocation5] sm:$0xff]  ;;  %vm57_vm1 = vcmask 261120   ;;  %v44_v6 = vld [vmem:[#allocation2 + $0x8] sm:$0xff] }
  0x1e   :  { %208 = vmatprep.mubr.msk.f32.mxu0 %vm309_vm0, %v308_v0  ;;  %211 = vmatprep.mubr.msk.f32.mxu1 %vm309_vm0, %v308_v0  ;;  %v43_v5 = vld [vmem:[#allocation2] sm:$0xff]  ;;  %v45_v7 = vld [vmem:[#allocation2 + $0x10] sm:$0xff] }
  0x1f   :  { %201 = vmatpush3.msra.mxu0 %v49_v1  ;;  %221 = vmatpush3.msra.mxu1 %v49_v1  ;;  %v189_v8 = vld [vmem:[%s357_s2] ss:$0 sm:$0xff]  ;;  %s310_s2 = smov [#allocation7]  }
  0x20   :  { %202 = vmatprep.subr.mxu0 %v308_v0  ;;  %218 = vmatprep.subr.mxu1 %v308_v0  ;;  %s176_s24 = sshll.u32 %s310_s2, 4  ;;  %s177_s24 = int_to_ptr.vmem [resolvable:$true] %s176_s24 }
  0x21   :  { %203 = vmatpush3.msra.mxu0 %v48_v2  ;;  %222 = vmatpush3.msra.mxu1 %v48_v2  ;;  %s278_s25 = scalar_lea.vmem %s177_s24, 384  ;;  %p283_p11 = scmp.lt.s32.totalorder %s177_s24, %s177_s24 }
  0x22   :  { %204 = vmatprep.subr.mxu0 %v308_v0  ;;  %219 = vmatprep.subr.mxu1 %v308_v0  ;;  %p279_p10 = scmp.ne.s32.totalorder %s177_s24, %s278_s25  ;;  %p284_p12 = scmp.lt.s32.totalorder %s278_s25, %s278_s25 }
  0x23   :  { %205 = vmatpush3.msra.mxu0 %v47_v3  ;;  %223 = vmatpush3.msra.mxu1 %v47_v3 }
  0x24   :  { %206 = vmatprep.subr.mxu0 %v308_v0  ;;  %220 = vmatprep.subr.mxu1 %v308_v0  ;;  %p285_p13 = por %p284_p12, %p283_p11 }
  0x25   :  { %207 = vmatpush3.msra.mxu0 %v46_v4  ;;  %224 = vmatpush3.msra.mxu1 %v46_v4 }
  0x26   :  { %209 = vmatmul.mubr.msk.f32.vlgmr.msra.gmra.mxu0 %vm57_vm1, %v43_v5  ;;  %212 = vmatmul.mubr.msk.f32.vlgmr.msra.gmra.mxu1 %vm57_vm1, %v44_v6  ;;  %p286_p0 = pnand %p285_p13, %p279_p10 }
  0x27   :  { %214 = vmatprep.mubr.msk.f32.mxu1 %vm309_vm0, %v308_v0 }
  0x2a   :  { %215 = vmatmul.mubr.msk.f32.gmra.mxu1 %vm57_vm1, %v45_v7 }
  0xe6   :  { %v133_v9 = vpop.f32.mrf.mxu0  ;;  %v138_v10 = vpop.f32.mrf.mxu1 }
  0xe7   :  { %v134_v11 = vadd.f32 %v189_v8, %v133_v9  ;;  %v139_v12 = vadd.f32 %v189_v8, %v138_v10 }
  0xe8   :  { %v210_v13 = vpop.f32.mrf.mxu0  ;;  %v213_v14 = vpop.f32.mrf.mxu1 }
  0xe9   :  { %v147_v15 = vmax.f32 %v134_v11, 0.0  ;;  %v148_v17 = vmax.f32 %v139_v12, 0.0 }
  0xea   :  { %v143_v16 = vpop.f32.mrf.mxu1 }
  0xeb   :  { %v144_v18 = vadd.f32 %v189_v8, %v143_v16  ;;  %v150_v19 = vmul.f32 %v147_v15, %v147_v15  ;;  %v151_v23 = vmul.f32 %v148_v17, %v148_v17 }
  0xec   :  { %v216_v20 = vpop.f32.mrf.mxu1 }
  0xed   :  { %v149_v21 = vmax.f32 %v144_v18, 0.0  ;;  %153 = vadd.xlane.f32.xlu0 %v150_v19 }
  0xef   :  { %v152_v22 = vmul.f32 %v149_v21, %v149_v21 }
  0xf1   :  { %157 = vadd.xlane.f32.xlu1 %v152_v22  ;;  %155 = vadd.xlane.f32.xlu0 %v151_v23 }
 0x176   :  { %v154_v24 = vpop.xlane.xlu0 %153 }
 0x177   :  { %v159_v25 = vmax.f32 %v154_v24, 1e-24 }
 0x179   :  { %232 = vrsqrt.f32 %v159_v25 }
 0x17a   :  { %v158_v26 = vpop.xlane.xlu1 %157  ;;  %v156_v27 = vpop.xlane.xlu0 %155 }
 0x17b   :  { %v161_v28 = vmax.f32 %v158_v26, 1e-24  ;;  %v160_v29 = vmax.f32 %v156_v27, 1e-24 }
 0x17d   :  { %234 = vrsqrt.f32 %v161_v28 }
 0x17e   :  { %236 = vrsqrt.f32 %v160_v29 }
 0x186   :  { %v233_v30 = vpop.eup %232 }
 0x187   :  { %v165_v31 = vmul.f32 %v233_v30, %v147_v15 }
 0x189   :  { %168 = vst [vmem:[#allocation7] sm:$0xff] %v165_v31 }
 0x18a   :  { %v235_v32 = vpop.eup %234 }
 0x18b   :  { %v237_v33 = vpop.eup %236  ;;  %v167_v34 = vmul.f32 %v235_v32, %v149_v21 }
 0x18c   :  { %v166_v35 = vmul.f32 %v237_v33, %v148_v17 }
 0x18d   :  { %170 = vst [vmem:[#allocation7 + $0x10] sm:$0xff] %v167_v34 }
 0x18e   :  { %169 = vst [vmem:[#allocation7 + $0x8] sm:$0xff] %v166_v35 }
 0x18f   :  { %289 = shalt.err (!%p286_p0)
}
 0x190   :  { %182 = dma.vmem_to_hbm [thread:$0]  %s177_s24, 384, %s358_s3, [#allocation4], %s305_s15, %s305_s15, %s306_s16  }
 0x191   :  { %302 = dma.done.wait [#allocation4], 384  }
 0x192   :  { %303 = vsyncadd [#allocation4], 4294966912 }
 0x193   :  { %186 = vsyncpa [#allocation3], 1 }
 0x194   :  { %187 = vsyncpa [#allocation6], 1 }
 0x195   :  { %188 = vsyncpa [#allocation4], 1 }

</bundles_post_ra>
